<compile_context>
chip_gen: v7x
topology: tpu7x:2x2x1
jax: 0.10.0
libtpu: 0.0.40
codegen_flags: <defaults>
</compile_context>

<pallas_src>
import jax
import jax.numpy as jnp
from jax.experimental import pallas as pl
from jax.experimental.pallas import tpu as pltpu


_MAX_INFLIGHT_DMAS = 4            # a few concurrent descriptors for big copies
_CHUNK_THRESHOLD_BYTES = 8 << 20  # below this a single DMA descriptor is plenty


def _chunk_bounds(shape, nbytes):
    """Static (start, size) slices along axis 0, or [None] for a full-ref copy."""
    if len(shape) == 0 or shape[0] < 2 or nbytes < _CHUNK_THRESHOLD_BYTES:
        return [None]
    dim0 = shape[0]
    n_chunks = min(_MAX_INFLIGHT_DMAS, dim0)
    base, rem = divmod(dim0, n_chunks)
    bounds, start = [], 0
    for i in range(n_chunks):
        size = base + (1 if i < rem else 0)
        bounds.append((start, size))
        start += size
    return bounds


def _make_identity_kernel(bounds):
    """Kernel: issue all chunk DMAs (HBM -> HBM), then wait for completion."""

    def kernel(x_hbm, o_hbm, sems):
        copies = []
        for i, b in enumerate(bounds):
            if b is None:
                src, dst = x_hbm, o_hbm
            else:
                start, size = b
                src = x_hbm.at[pl.ds(start, size)]
                dst = o_hbm.at[pl.ds(start, size)]
            cp = pltpu.make_async_copy(src, dst, sems.at[i])
            cp.start()
            copies.append(cp)
        for cp in copies:
            cp.wait()

    return kernel


def identity(x):
    """Pallas identity: returns an array equal to x (same shape & dtype)."""
    if x.size == 0:
        # Nothing to DMA for zero-element arrays; identity is a no-op.
        return x

    itemsize = jnp.dtype(x.dtype).itemsize
    nbytes = x.size * itemsize
    bounds = _chunk_bounds(x.shape, nbytes)

    return pl.pallas_call(
        _make_identity_kernel(bounds),
        in_specs=[pl.BlockSpec(memory_space=pl.ANY)],
        out_specs=pl.BlockSpec(memory_space=pl.ANY),
        out_shape=jax.ShapeDtypeStruct(x.shape, x.dtype),
        scratch_shapes=[pltpu.SemaphoreType.DMA((len(bounds),))],
        cost_estimate=pl.CostEstimate(
            flops=0, transcendentals=0, bytes_accessed=2 * nbytes),
    )(x)


if __name__ == "__main__":
    key = jax.random.PRNGKey(0)
    # Small input consistent with the module (Identity accepts any shape):
    # batch=2, channels=4, spatial=16x16.
    x = jax.random.normal(key, (2, 4, 16, 16), jnp.float32)

    fwd = jax.jit(identity)
    y = fwd(x)
    jax.block_until_ready(y)

    assert y.shape == x.shape and y.dtype == x.dtype
    assert bool(jnp.array_equal(y, x))
    print("KERNEL_OK")
</pallas_src>

<mosaic_0001>
module attributes {stable_mosaic.version = 11 : i64} {
  func.func @kernel(%arg0: memref<2x4x16x16xf32, #tpu.memory_space<any>>, %arg1: memref<2x4x16x16xf32, #tpu.memory_space<any>>, %arg2: memref<1x!tpu.dma_semaphore, #tpu.memory_space<semaphore_mem>>) attributes {dimension_semantics = [], scalar_prefetch = 0 : i64, scratch_operands = 1 : i64, tpu.core_type = #tpu.core_type<tc>} {
    %c0_i32 = arith.constant 0 : i32
    %0 = tpu.memref_slice %arg2[%c0_i32] : memref<1x!tpu.dma_semaphore, #tpu.memory_space<semaphore_mem>> -> memref<1x!tpu.dma_semaphore, #tpu.memory_space<semaphore_mem>>
    %1 = tpu.memref_squeeze %0 : memref<1x!tpu.dma_semaphore, #tpu.memory_space<semaphore_mem>> -> memref<!tpu.dma_semaphore, #tpu.memory_space<semaphore_mem>>
    tpu.enqueue_dma source(%arg0 : memref<2x4x16x16xf32, #tpu.memory_space<any>>) target(%arg1 : memref<2x4x16x16xf32, #tpu.memory_space<any>>) target_semaphore(%1 : memref<!tpu.dma_semaphore, #tpu.memory_space<semaphore_mem>>)
    %c0_i32_0 = arith.constant 0 : i32
    %2 = tpu.memref_slice %arg2[%c0_i32_0] : memref<1x!tpu.dma_semaphore, #tpu.memory_space<semaphore_mem>> -> memref<1x!tpu.dma_semaphore, #tpu.memory_space<semaphore_mem>>
    %3 = tpu.memref_squeeze %2 : memref<1x!tpu.dma_semaphore, #tpu.memory_space<semaphore_mem>> -> memref<!tpu.dma_semaphore, #tpu.memory_space<semaphore_mem>>
    tpu.wait_dma2 semaphore(%3 : memref<!tpu.dma_semaphore, #tpu.memory_space<semaphore_mem>>) src(%arg0 : memref<2x4x16x16xf32, #tpu.memory_space<any>>) dst(%arg1 : memref<2x4x16x16xf32, #tpu.memory_space<any>>)
    return
  }
}

</mosaic_0001>

<bundles_post_ra>
// kernel: identity.1
= control target key start
LH: loop header
LB: loop body
LE: loop exit
PB: predicated region body
PF: predicated region fallthrough
CT: control target
= control target key end

     0   :  { %s36_s6 = smov [#allocation2]   ;;  %s37_s7 = smov [#allocation3]   ;;  %s55_s0 = inlined_call_operand.hbm [shape: f32[2,4,16,16], index: 0, kind: input, shape index: {}]   ;;  %s56_s1 = inlined_call_operand.hbm [shape: f32[2,4,16,16], index: 1, kind: output, shape index: {}]  }
   0x1   :  { %s38_s8 = smov 0  }
   0x2   :  { %18 = dma.general %s55_s0, 2048, %s56_s1, %s36_s6, %s37_s7, [#allocation4], %s38_s8, 0  }
   0x3   :  { %34 = dma.done.wait [#allocation2], 2048 }
   0x4   :  { %35 = vsyncadd [#allocation2], 4294965248 }
   0x5   :  { %24 = vsyncmov [#allocation2] }
   0x8   :  { %s25_s13 = vpop.sfrf %24 }
   0x9   :  { %p30_p0 = scmp.ne.s32.totalorder %s25_s13, 0 }
   0xb   :  { %29 = shalt.err (%p30_p0)  }

</bundles_post_ra>
